<compile_context>
chip_gen: v6e
topology: v6e:2x2x1
jax: 0.10.0
libtpu: 0.0.40
codegen_flags: <defaults>
</compile_context>

<pallas_src>
import functools

import jax
import jax.numpy as jnp
from jax.experimental import pallas as pl
from jax.experimental.pallas import tpu as pltpu


def _uncertainty_kernel(x_ref, w1_ref, b1_ref, w2_ref, b2_ref, w3_ref, b3_ref,
                        o_ref):
    # x_ref: (C, T) f32 block -- pixels on the lane axis.  Cast in-kernel.
    x = x_ref[...].astype(jnp.bfloat16)

    # linear1 + relu: (64, C) @ (C, T) -> (64, T), f32 accumulation on MXU.
    h1 = jnp.dot(w1_ref[...], x, preferred_element_type=jnp.float32)
    h1 = jnp.maximum(h1 + b1_ref[...], 0.0).astype(jnp.bfloat16)

    # linear2 + relu: (16, 64) @ (64, T) -> (16, T), f32 accumulation on MXU.
    h2 = jnp.dot(w2_ref[...], h1, preferred_element_type=jnp.float32)
    h2 = jnp.maximum(h2 + b2_ref[...], 0.0)                 # stay f32 (VPU)

    # linear3 on VPU + XLU instead of MXU: broadcast-multiply by the w3 column
    # and sublane-reduce the 16 rows (f32).  Saves a full T-wide MXU stream.
    w3c = w3_ref[...].astype(jnp.float32)                   # (16, 1)
    h3 = jnp.sum(h2 * w3c, axis=0, keepdims=True)           # (1, T) f32
    h3 = h3 + b3_ref[0]

    # numerically stable softplus: max(x, 0) + log1p(exp(-|x|))  (EUP ops)
    out = jnp.maximum(h3, 0.0) + jnp.log1p(jnp.exp(-jnp.abs(h3)))

    # lane-dense (1, T) store.
    o_ref[...] = out.astype(o_ref.dtype)


def _pick_tile_hw(hw, c, *, max_tile=2048, vmem_input_budget=24 << 20,
                  n_buffers=2):
    """Fixed lane-dense pixel tile: multiple of 128, <= max_tile, sized so the
    double-buffered f32 (C, tile) input block stays within the VMEM budget."""
    hw_padded = ((hw + 127) // 128) * 128
    tile = max(128, (min(max_tile, hw_padded) // 128) * 128)
    while tile > 128 and n_buffers * c * tile * 4 > vmem_input_budget:
        tile -= 128
    return tile


def uncertainty_forward(x_nchw, params, *, max_tile_hw=2048):
    """x_nchw: (B, C, H, W) float32. Returns (B, 1, H, W) bf16."""
    w1, b1, w2, b2, w3, b3 = params
    B, C, H, W = x_nchw.shape
    HW = H * W

    tile_hw = _pick_tile_hw(HW, C, max_tile=max_tile_hw)
    n_tiles = pl.cdiv(HW, tile_hw)
    # Guarantee >= 2 parallel grid steps so both v7x TensorCores get work.
    while B * n_tiles < 2 and tile_hw > 128:
        tile_hw = max(128, ((tile_hw // 2) // 128) * 128)
        n_tiles = pl.cdiv(HW, tile_hw)
    grid = (B, n_tiles)

    # Explicit scoped-VMEM limit (v7x has only 64 MiB physical / 32 MiB
    # default scoped); estimate usage and add generous headroom.
    in_buf_bytes = 2 * C * tile_hw * 4                       # dbl-buf f32 input
    interm_bytes = (2 * C + 4 * (64 + 16 + 16 + 4)) * tile_hw  # bf16 x + f32 h*
    weight_bytes = 2 * (64 * C + 64 + 16 * 64 + 16 + 16 + 1) * 4
    out_buf_bytes = 2 * tile_hw * 2                          # dbl-buf bf16 out
    vmem_est = in_buf_bytes + interm_bytes + weight_bytes + out_buf_bytes
    vmem_limit = max(16 << 20, min(48 << 20, int(1.5 * vmem_est) + (8 << 20)))

    # Free view of the contiguous NCHW input -- no transpose, no cast.
    x3 = x_nchw.reshape(B, C, HW)
    w3_col = w3.reshape(16, 1)                               # (1,16) -> (16,1)

    out = pl.pallas_call(
        _uncertainty_kernel,
        out_shape=jax.ShapeDtypeStruct((B, 1, HW), jnp.bfloat16),
        grid=grid,
        in_specs=[
            # activation tile: kernel sees (C, tile_hw); last block may be
            # partial (masked by Pallas).
            pl.BlockSpec((None, C, tile_hw), lambda b, j: (b, 0, j)),
            # grid-invariant weights/biases (tiny; double-buffer cost trivial)
            pl.BlockSpec((64, C), lambda b, j: (0, 0)),       # w1 (out, in)
            pl.BlockSpec((64, 1), lambda b, j: (0, 0)),       # b1
            pl.BlockSpec((16, 64), lambda b, j: (0, 0)),      # w2
            pl.BlockSpec((16, 1), lambda b, j: (0, 0)),       # b2
            pl.BlockSpec((16, 1), lambda b, j: (0, 0)),       # w3 (column)
            pl.BlockSpec(memory_space=pltpu.MemorySpace.SMEM),  # b3 scalar
        ],
        # lane-dense output blocks; (B, 1, HW) reshapes to (B, 1, H, W) free.
        out_specs=pl.BlockSpec((None, 1, tile_hw), lambda b, j: (b, 0, j)),
        compiler_params=pltpu.CompilerParams(
            dimension_semantics=("parallel", "parallel"),
            vmem_limit_bytes=vmem_limit),
    )(x3, w1, b1, w2, b2, w3_col, b3)

    return out.reshape(B, 1, H, W)


def _xavier_uniform(key, fan_in, fan_out, dtype):
    # matches nn.init.xavier_uniform_ on a (fan_out, fan_in) torch weight.
    bound = (6.0 / (fan_in + fan_out)) ** 0.5
    return jax.random.uniform(key, (fan_out, fan_in), dtype=jnp.float32,
                              minval=-bound, maxval=bound).astype(dtype)


def init_params(key, in_channels):
    k1, k2, k3 = jax.random.split(key, 3)
    w1 = _xavier_uniform(k1, in_channels, 64, jnp.bfloat16)   # (64, C)
    b1 = jnp.zeros((64, 1), jnp.float32)
    w2 = _xavier_uniform(k2, 64, 16, jnp.bfloat16)            # (16, 64)
    b2 = jnp.zeros((16, 1), jnp.float32)
    w3 = _xavier_uniform(k3, 16, 1, jnp.bfloat16)             # (1, 16)
    b3 = jnp.zeros((1,), jnp.float32)
    return (w1, b1, w2, b2, w3, b3)


def _reference_forward(x_nchw, params):
    """Plain-JAX reference matching the PyTorch forward (bf16 activations)."""
    w1, b1, w2, b2, w3, b3 = params
    B, C, H, W = x_nchw.shape
    x = x_nchw.astype(jnp.bfloat16)
    x = jnp.transpose(x, (0, 2, 3, 1)).reshape(B * H * W, C)
    h1 = jnp.dot(x, w1.T, preferred_element_type=jnp.float32) + b1.reshape(1, -1)
    h1 = jnp.maximum(h1, 0.0).astype(jnp.bfloat16)
    h2 = jnp.dot(h1, w2.T, preferred_element_type=jnp.float32) + b2.reshape(1, -1)
    h2 = jnp.maximum(h2, 0.0).astype(jnp.bfloat16)
    h3 = jnp.dot(h2, w3.T, preferred_element_type=jnp.float32) + b3.reshape(1, -1)
    out = jnp.maximum(h3, 0.0) + jnp.log1p(jnp.exp(-jnp.abs(h3)))
    out = out.astype(jnp.bfloat16).reshape(B, H, W, 1)
    return jnp.transpose(out, (0, 3, 1, 2))


def _check_case(batch, in_channels, height, width, params, fwd, seed):
    key_x = jax.random.PRNGKey(seed)
    x = jax.random.normal(key_x, (batch, in_channels, height, width),
                          dtype=jnp.float32)
    out = fwd(x, params)
    jax.block_until_ready(out)

    assert out.shape == (batch, 1, height, width), out.shape
    assert out.dtype == jnp.bfloat16, out.dtype
    out_f32 = out.astype(jnp.float32)
    # softplus output must be finite and non-negative (bf16 can underflow to 0)
    assert bool(jnp.all(jnp.isfinite(out_f32)))
    assert bool(jnp.all(out_f32 >= 0.0))

    # correctness vs. plain-JAX reference (bf16 tolerance)
    ref = _reference_forward(x, params).astype(jnp.float32)
    max_abs = jnp.max(jnp.abs(out_f32 - ref))
    assert float(max_abs) <= 5e-2, float(max_abs)


if __name__ == "__main__":
    # Small but representative: UncertaintyModule(in_channels=128, ...).
    in_channels = 128
    key = jax.random.PRNGKey(0)
    _, key_p = jax.random.split(key)
    params = init_params(key_p, in_channels)

    fwd = jax.jit(functools.partial(uncertainty_forward, max_tile_hw=2048))

    # Case 1: HW a multiple of 128, multiple batches (16x16, B=2).
    _check_case(2, in_channels, 16, 16, params, fwd, seed=1)
    # Case 2: B=1 with HW=640 -- exercises the cdiv grid / partial last block
    # and the tile-halving path that keeps >= 2 parallel grid steps.
    _check_case(1, in_channels, 16, 40, params, fwd, seed=2)

    print("KERNEL_OK")
</pallas_src>

<mosaic_0001>
module attributes {stable_mosaic.version = 11 : i64} {
  func.func @_uncertainty_kernel(%arg0: i32, %arg1: i32, %arg2: memref<1x128x256xf32, #tpu.memory_space<vmem>>, %arg3: memref<64x128xbf16, #tpu.memory_space<vmem>>, %arg4: memref<64x1xf32, #tpu.memory_space<vmem>>, %arg5: memref<16x64xbf16, #tpu.memory_space<vmem>>, %arg6: memref<16x1xf32, #tpu.memory_space<vmem>>, %arg7: memref<16x1xbf16, #tpu.memory_space<vmem>>, %arg8: memref<1xf32, #tpu.memory_space<smem>>, %arg9: memref<1x1x256xbf16, #tpu.memory_space<vmem>>) attributes {dimension_semantics = [#tpu.dimension_semantics<parallel>, #tpu.dimension_semantics<parallel>], iteration_bounds = array<i64: 2, 1>, scalar_prefetch = 0 : i64, scratch_operands = 0 : i64, tpu.core_type = #tpu.core_type<tc>, window_params = [{transform_indices = @transform_0, window_bounds = array<i64: 1, 128, 256>}, {pipeline_mode = #tpu.pipeline_mode<synchronous>, transform_indices = @transform_1, window_bounds = array<i64: 64, 128>}, {pipeline_mode = #tpu.pipeline_mode<synchronous>, transform_indices = @transform_2, window_bounds = array<i64: 64, 1>}, {pipeline_mode = #tpu.pipeline_mode<synchronous>, transform_indices = @transform_3, window_bounds = array<i64: 16, 64>}, {pipeline_mode = #tpu.pipeline_mode<synchronous>, transform_indices = @transform_4, window_bounds = array<i64: 16, 1>}, {pipeline_mode = #tpu.pipeline_mode<synchronous>, transform_indices = @transform_5, window_bounds = array<i64: 16, 1>}, {transform_indices = @transform_6, window_bounds = array<i64: 1>}, {transform_indices = @transform_7, window_bounds = array<i64: 1, 1, 256>}]} {
    %c0 = arith.constant 0 : index
    %c0_0 = arith.constant 0 : index
    %c0_1 = arith.constant 0 : index
    %0 = vector.load %arg2[%c0, %c0_0, %c0_1] : memref<1x128x256xf32, #tpu.memory_space<vmem>>, vector<1x128x256xf32>
    %1 = vector.shape_cast %0 : vector<1x128x256xf32> to vector<128x256xf32>
    %2 = arith.truncf %1 : vector<128x256xf32> to vector<128x256xbf16>
    %c0_2 = arith.constant 0 : index
    %c0_3 = arith.constant 0 : index
    %3 = vector.load %arg3[%c0_2, %c0_3] : memref<64x128xbf16, #tpu.memory_space<vmem>>, vector<64x128xbf16>
    %cst = arith.constant dense<0.000000e+00> : vector<64x256xf32>
    %4 = tpu.matmul %3, %2, %cst {dimension_numbers = #tpu.dot_dimension_numbers<[1], [0], [0], [1], [0, 0, 1, 1], [], []>} : vector<64x128xbf16>, vector<128x256xbf16>, vector<64x256xf32> -> vector<64x256xf32>
    %c0_4 = arith.constant 0 : index
    %c0_5 = arith.constant 0 : index
    %5 = vector.load %arg4[%c0_4, %c0_5] : memref<64x1xf32, #tpu.memory_space<vmem>>, vector<64x1xf32>
    %6 = vector.broadcast %5 : vector<64x1xf32> to vector<64x256xf32>
    %7 = arith.addf %4, %6 : vector<64x256xf32>
    %cst_6 = arith.constant 0.000000e+00 : f32
    %8 = vector.broadcast %cst_6 : f32 to vector<64x256xf32>
    %9 = arith.maximumf %7, %8 : vector<64x256xf32>
    %10 = arith.truncf %9 : vector<64x256xf32> to vector<64x256xbf16>
    %c0_7 = arith.constant 0 : index
    %c0_8 = arith.constant 0 : index
    %11 = vector.load %arg5[%c0_7, %c0_8] : memref<16x64xbf16, #tpu.memory_space<vmem>>, vector<16x64xbf16>
    %cst_9 = arith.constant dense<0.000000e+00> : vector<16x256xf32>
    %12 = tpu.matmul %11, %10, %cst_9 {dimension_numbers = #tpu.dot_dimension_numbers<[1], [0], [0], [1], [0, 0, 1, 1], [], []>} : vector<16x64xbf16>, vector<64x256xbf16>, vector<16x256xf32> -> vector<16x256xf32>
    %c0_10 = arith.constant 0 : index
    %c0_11 = arith.constant 0 : index
    %13 = vector.load %arg6[%c0_10, %c0_11] : memref<16x1xf32, #tpu.memory_space<vmem>>, vector<16x1xf32>
    %14 = vector.broadcast %13 : vector<16x1xf32> to vector<16x256xf32>
    %15 = arith.addf %12, %14 : vector<16x256xf32>
    %cst_12 = arith.constant 0.000000e+00 : f32
    %16 = vector.broadcast %cst_12 : f32 to vector<16x256xf32>
    %17 = arith.maximumf %15, %16 : vector<16x256xf32>
    %c0_13 = arith.constant 0 : index
    %c0_14 = arith.constant 0 : index
    %18 = vector.load %arg7[%c0_13, %c0_14] : memref<16x1xbf16, #tpu.memory_space<vmem>>, vector<16x1xbf16>
    %19 = arith.extf %18 : vector<16x1xbf16> to vector<16x1xf32>
    %20 = vector.broadcast %19 : vector<16x1xf32> to vector<16x256xf32>
    %21 = arith.mulf %17, %20 : vector<16x256xf32>
    %cst_15 = arith.constant dense<0.000000e+00> : vector<256xf32>
    %22 = vector.multi_reduction <add>, %21, %cst_15 [0] : vector<16x256xf32> to vector<256xf32>
    %23 = vector.shape_cast %22 : vector<256xf32> to vector<1x256xf32>
    %c0_16 = arith.constant 0 : index
    %24 = memref.load %arg8[%c0_16] : memref<1xf32, #tpu.memory_space<smem>>
    %25 = vector.broadcast %24 : f32 to vector<1x256xf32>
    %26 = arith.addf %23, %25 : vector<1x256xf32>
    %cst_17 = arith.constant 0.000000e+00 : f32
    %27 = vector.broadcast %cst_17 : f32 to vector<1x256xf32>
    %28 = arith.maximumf %26, %27 : vector<1x256xf32>
    %29 = math.absf %26 : vector<1x256xf32>
    %cst_18 = arith.constant 0.000000e+00 : f32
    %30 = vector.broadcast %cst_18 : f32 to vector<1x256xf32>
    %31 = arith.subf %30, %29 : vector<1x256xf32>
    %32 = math.exp %31 : vector<1x256xf32>
    %33 = math.log1p %32 : vector<1x256xf32>
    %34 = arith.addf %28, %33 : vector<1x256xf32>
    %35 = arith.truncf %34 : vector<1x256xf32> to vector<1x256xbf16>
    %c0_19 = arith.constant 0 : index
    %c0_20 = arith.constant 0 : index
    %c0_21 = arith.constant 0 : index
    %36 = vector.load %arg9[%c0_19, %c0_20, %c0_21] : memref<1x1x256xbf16, #tpu.memory_space<vmem>>, vector<1x1x256xbf16>
    %37 = vector.shape_cast %36 : vector<1x1x256xbf16> to vector<1x256xbf16>
    %38 = vector.shape_cast %35 : vector<1x256xbf16> to vector<1x1x256xbf16>
    tpu.vector_store %arg9[%c0_19, %c0_20, %c0_21], %38 {strides = array<i32>} : memref<1x1x256xbf16, #tpu.memory_space<vmem>>, vector<1x1x256xbf16>,
    return
  }
  func.func @transform_0(%arg0: i32, %arg1: i32) -> (i32, i32, i32) {
    %c0_i32 = arith.constant 0 : i32
    %c0_i32_0 = arith.constant 0 : i32
    return %arg0, %c0_i32, %arg1 : i32, i32, i32
  }
  func.func @transform_1(%arg0: i32, %arg1: i32) -> (i32, i32) {
    %c0_i32 = arith.constant 0 : i32
    %c0_i32_0 = arith.constant 0 : i32
    %c0_i32_1 = arith.constant 0 : i32
    return %c0_i32, %c0_i32_0 : i32, i32
  }
  func.func @transform_2(%arg0: i32, %arg1: i32) -> (i32, i32) {
    %c0_i32 = arith.constant 0 : i32
    %c0_i32_0 = arith.constant 0 : i32
    %c0_i32_1 = arith.constant 0 : i32
    return %c0_i32, %c0_i32_0 : i32, i32
  }
  func.func @transform_3(%arg0: i32, %arg1: i32) -> (i32, i32) {
    %c0_i32 = arith.constant 0 : i32
    %c0_i32_0 = arith.constant 0 : i32
    %c0_i32_1 = arith.constant 0 : i32
    return %c0_i32, %c0_i32_0 : i32, i32
  }
  func.func @transform_4(%arg0: i32, %arg1: i32) -> (i32, i32) {
    %c0_i32 = arith.constant 0 : i32
    %c0_i32_0 = arith.constant 0 : i32
    %c0_i32_1 = arith.constant 0 : i32
    return %c0_i32, %c0_i32_0 : i32, i32
  }
  func.func @transform_5(%arg0: i32, %arg1: i32) -> (i32, i32) {
    %c0_i32 = arith.constant 0 : i32
    %c0_i32_0 = arith.constant 0 : i32
    %c0_i32_1 = arith.constant 0 : i32
    return %c0_i32, %c0_i32_0 : i32, i32
  }
  func.func @transform_6(%arg0: i32, %arg1: i32) -> i32 {
    %c0_i32 = arith.constant 0 : i32
    %c0_i32_0 = arith.constant 0 : i32
    return %c0_i32 : i32
  }
  func.func @transform_7(%arg0: i32, %arg1: i32) -> (i32, i32, i32) {
    %c0_i32 = arith.constant 0 : i32
    %c0_i32_0 = arith.constant 0 : i32
    return %arg0, %c0_i32, %arg1 : i32, i32, i32
  }
}

</mosaic_0001>

<bundles_post_ra>
// kernel: uncertainty_forward.1
= control target key start
LH: loop header
LB: loop body
LE: loop exit
PB: predicated region body
PF: predicated region fallthrough
CT: control target
= control target key end

     0   :  { %s927_s26 = smov 0   ;;  %s929_s27 = smov 0   ;;  %s1053_s0 = inlined_call_operand.vmem [shape: f32[2,128,256], index: 0, kind: input, shape index: {}]   ;;  %s1054_s1 = inlined_call_operand.vmem [shape: bf16[64,128], index: 1, kind: input, shape index: {}]   ;;  %s1055_s2 = inlined_call_operand.vmem [shape: f32[64,1], index: 2, kind: input, shape index: {}]   ;;  %s1056_s3 = inlined_call_operand.vmem [shape: bf16[16,64], index: 3, kind: input, shape index: {}]   ;;  %s1057_s4 = inlined_call_operand.vmem [shape: f32[16,1], index: 4, kind: input, shape index: {}]   ;;  %s1058_s5 = inlined_call_operand.vmem [shape: bf16[16,1], index: 5, kind: input, shape index: {}]   ;;  %s1059_s6 = inlined_call_operand.<no memory space> [shape: f32[1], index: 6, kind: input, shape index: {}]   ;;  %s1060_s7 = inlined_call_operand.vmem [shape: bf16[2,1,256], index: 7, kind: output, shape index: {}]  }
   0x1   :  { %12 = sst [smem:[#allocation2]] %s1059_s6  ;;  %s931_s28 = smov 0  }
   0x2 LB: > { %s30_s6 = sadd.s32 1, %s876_s27  ;;  %p794_p0 = scmp.ge.s32.totalorder %s880_s28, 1  ;;  %s880_s28 = sphi %s931_s28, %s18_s28   ;;  %s876_s27 = sphi %s929_s27, %s1062_s27   ;;  %s872_s26 = sphi %s927_s26, %s1061_s26  }
   0x3   : > { %p32_p1 = scmp.ge.s32.totalorder %s30_s6, 2  ;;  %p259_p2 = scmp.lt.s32.totalorder %s880_s28, 3 }
   0x5   : > { %s1064_s6 = smov (%p32_p1, %s30_s6), 0  ;;  %p260_p3 = pnand %p794_p0, %p259_p2 }
   0x6   : > { %p299_p4 = scmp.lt.s32.totalorder (!%p260_p3), %s872_s26, 1  ;;  %s645_s22 = sld [smem:[#allocation2]] (!%p260_p3) }
   0x7   : > { %263 = sbr.rel (%p260_p3) target bundleno = 565 (0x235), region = 48 }
   0xc   : > { %v882_v0 = vmov 0   ;;  %s1066_s26 = smov (!%p299_p4, %s872_s26), 1  ;;  %v380_v1 = vld [vmem:[%s1055_s2 + $0x30] sm:$0xff]  ;;  %v381_v2 = vld [vmem:[%s1055_s2 + $0x38] sm:$0xff]  ;;  %v378_v3 = vld [vmem:[%s1055_s2 + $0x20] sm:$0xff]  ;;  %vm562_vm0 = vcmask 523264  }
   0xd   : > { %478 = vmatprep.mubr.bf16.mxu0 %v882_v0  ;;  %838 = vset.pattern.permute.xlu0 %v882_v0  ;;  %s807_s29 = sshll.u32 %s1066_s26, 8  ;;  %v379_v4 = vld [vmem:[%s1055_s2 + $0x28] sm:$0xff]  ;;  %v376_v19 = vld [vmem:[%s1055_s2 + $0x10] sm:$0xff]  ;;  %v377_v31 = vld [vmem:[%s1055_s2 + $0x18] sm:$0xff]  ;;  %vm699_vm2 = vcmask 1040384   ;;  %s797_s23 = sshll.u32 %s1066_s26, 1 }
   0xe   : > { %839 = vset.pattern.permute.xlu1 %v882_v0  ;;  %598 = vmatprep.mubr.bf16.mxu1 %v882_v0  ;;  %s958_s11 = scalar_lea.vmem %s1053_s0, %s807_s29  ;;  %v374_v33 = vld [vmem:[%s1055_s2] sm:$0xff]  ;;  %v375_v35 = vld [vmem:[%s1055_s2 + $0x8] sm:$0xff]  ;;  %vm700_vm4 = vsmask.f32 256  ;;  %vm702_vm5 = vcmask 1041409   ;;  %s315_s29 = scalar_lea.vmem %s1060_s7, %s797_s23 }
   0xf   : > { %414 = vperm.xlu0 %838, %v380_v1   ;;  %v347_v5 = vld [vmem:[%s958_s11 + $0xe8] sm:$0xff]  ;;  %v349_v6 = vld [vmem:[%s958_s11 + $0xf8] sm:$0xff]  ;;  %v346_v7 = vld [vmem:[%s958_s11 + $0xe0] sm:$0xff]  ;;  %404 = vperm.xlu1 %839, %v378_v3   ;;  %vm703_vm6 = vsmask.f32 1280 }
  0x10   : > { %v365_v8 = vpack.c.bf16 %v349_v6, %v347_v5  ;;  %v348_v9 = vld [vmem:[%s958_s11 + $0xf0] sm:$0xff]  ;;  %v343_v10 = vld [vmem:[%s958_s11 + $0xc8] sm:$0xff]  ;;  %v345_v11 = vld [vmem:[%s958_s11 + $0xd8] sm:$0xff] }
  0x11   : > { %v364_v12 = vpack.c.bf16 %v348_v9, %v346_v7  ;;  %v363_v13 = vpack.c.bf16 %v345_v11, %v343_v10  ;;  %v342_v14 = vld [vmem:[%s958_s11 + $0xc0] sm:$0xff]  ;;  %v344_v15 = vld [vmem:[%s958_s11 + $0xd0] sm:$0xff]  ;;  %v339_v16 = vld [vmem:[%s958_s11 + $0xa8] sm:$0xff] }
  0x12   : > { %446 = vmatprep.subr.bf16.mxu0 %v365_v8  ;;  %v341_v17 = vld [vmem:[%s958_s11 + $0xb8] sm:$0xff]  ;;  %v362_v18 = vpack.c.bf16 %v344_v15, %v342_v14  ;;  %v338_v21 = vld [vmem:[%s958_s11 + $0xa0] sm:$0xff]  ;;  %v340_v22 = vld [vmem:[%s958_s11 + $0xb0] sm:$0xff] }
  0x13   : > { %419 = vperm.xlu0 %838, %v381_v2   ;;  %447 = vmatpush1.bf16.msra.mxu0 %v364_v12  ;;  %v361_v20 = vpack.c.bf16 %v341_v17, %v339_v16  ;;  %v335_v23 = vld [vmem:[%s958_s11 + $0x88] sm:$0xff]  ;;  %v337_v24 = vld [vmem:[%s958_s11 + $0x98] sm:$0xff]  ;;  %v360_v25 = vpack.c.bf16 %v340_v22, %v338_v21  ;;  %v334_v27 = vld [vmem:[%s958_s11 + $0x80] sm:$0xff] }
  0x14   : > { %409 = vperm.xlu1 %839, %v379_v4   ;;  %448 = vmatprep.subr.bf16.mxu0 %v363_v13  ;;  %v359_v26 = vpack.c.bf16 %v337_v24, %v335_v23  ;;  %v336_v28 = vld [vmem:[%s958_s11 + $0x90] sm:$0xff]  ;;  %v331_v29 = vld [vmem:[%s958_s11 + $0x68] sm:$0xff]  ;;  %v333_v30 = vld [vmem:[%s958_s11 + $0x78] sm:$0xff] }
  0x15   : > { %v330_v32 = vld [vmem:[%s958_s11 + $0x60] sm:$0xff]  ;;  %v358_v34 = vpack.c.bf16 %v336_v28, %v334_v27  ;;  %v357_v37 = vpack.c.bf16 %v333_v30, %v331_v29  ;;  %v332_v38 = vld [vmem:[%s958_s11 + $0x70] sm:$0xff]  ;;  %v327_v42 = vld [vmem:[%s958_s11 + $0x48] sm:$0xff] }
  0x16   : > { %v809_v36 = vld [vmem:[%s1058_s5] sm:$0xff]   ;;  %v329_v43 = vld [vmem:[%s958_s11 + $0x58] sm:$0xff]  ;;  %v356_v44 = vpack.c.bf16 %v332_v38, %v330_v32  ;;  %v546_v46 = vld [vmem:[%s1057_s4 + $0x8] sm:$0xff] }
  0x17   : > { %394 = vperm.xlu0 %838, %v376_v19   ;;  %449 = vmatpush1.bf16.msra.mxu0 %v362_v18  ;;  %v545_v39 = vld [vmem:[%s1057_s4] sm:$0xff]  ;;  %v810_v40 = vunpack.c.l.bf16 %v809_v36  ;;  %v811_v41 = vunpack.c.h.bf16 %v809_v36  ;;  %v355_v47 = vpack.c.bf16 %v329_v43, %v327_v42  ;;  %v328_v49 = vld [vmem:[%s958_s11 + $0x50] sm:$0xff]  ;;  %v323_v50 = vld [vmem:[%s958_s11 + $0x28] sm:$0xff] }
  0x18   : > { %450 = vmatprep.subr.bf16.mxu0 %v361_v20  ;;  %399 = vperm.xlu1 %839, %v377_v31   ;;  %v326_v48 = vld [vmem:[%s958_s11 + $0x40] sm:$0xff]  ;;  %v325_v51 = vld [vmem:[%s958_s11 + $0x38] sm:$0xff]  ;;  %v324_v55 = vld [vmem:[%s958_s11 + $0x30] sm:$0xff] }
  0x19   : > { %v840_v45 = vpack.i.bf16 %v811_v41, %v810_v40  ;;  %v354_v52 = vpack.c.bf16 %v328_v49, %v326_v48  ;;  %v353_v53 = vpack.c.bf16 %v325_v51, %v323_v50  ;;  %v322_v54 = vld [vmem:[%s958_s11 + $0x20] sm:$0xff]  ;;  %v319_v56 = vld [vmem:[%s958_s11 + $0x8] sm:$0xff]  ;;  %v321_v57 = vld [vmem:[%s958_s11 + $0x18] sm:$0xff] }
  0x1a   : > { %v352_v58 = vpack.c.bf16 %v324_v55, %v322_v54  ;;  %v351_v59 = vpack.c.bf16 %v321_v57, %v319_v56  ;;  %v318_v60 = vld [vmem:[%s958_s11] sm:$0xff]  ;;  %v320_v61 = vld [vmem:[%s958_s11 + $0x10] sm:$0xff]  ;;  %v846_v1 = vld [vmem:[%s1054_s1 + $0x8] sm:$0xff]  }
  0x1b   : > { %451 = vmatpush1.bf16.msra.mxu0 %v360_v25  ;;  %384 = vperm.xlu0 %838, %v374_v33   ;;  %v350_v62 = vpack.c.bf16 %v320_v61, %v318_v60  ;;  %v845_v63 = vld [vmem:[%s1054_s1] sm:$0xff]   ;;  %v847_v2 = vld [vmem:[%s1054_s1 + $0x10] sm:$0xff]   ;;  %v848_v3 = vld [vmem:[%s1054_s1 + $0x18] sm:$0xff]  }
  0x1c   : > { %452 = vmatprep.subr.bf16.mxu0 %v359_v26  ;;  %389 = vperm.xlu1 %839, %v375_v35   ;;  %vm701_vm7 = vmand %vm699_vm2, %vm700_vm4 }
  0x1d   : > { %vm704_vm8 = vmand %vm702_vm5, %vm703_vm6 }
  0x1e   : > { %vm705_vm9 = vmor %vm704_vm8, %vm701_vm7 }
  0x1f   : > { %453 = vmatpush1.bf16.msra.mxu0 %v358_v34  ;;  %549 = vperm.xlu0 %838, %v545_v39  }
  0x20   : > { %454 = vmatprep.subr.bf16.mxu0 %v357_v37  ;;  %554 = vperm.xlu1 %839, %v546_v46  }
  0x23   : > { %455 = vmatpush1.bf16.msra.mxu0 %v356_v44  ;;  %841 = vperm.xlu0 %838, %v840_v45  }
  0x24   : > { %456 = vmatprep.subr.bf16.mxu0 %v355_v47 }
  0x27   : > { %457 = vmatpush1.bf16.msra.mxu0 %v354_v52 }
  0x28   : > { %458 = vmatprep.subr.bf16.mxu0 %v353_v53 }
  0x2b   : > { %459 = vmatpush1.bf16.msra.mxu0 %v352_v58 }
  0x2c   : > { %460 = vmatprep.subr.bf16.mxu0 %v351_v59 }
  0x2f   : > { %461 = vmatpush1.bf16.msra.mxu0 %v350_v62 }
  0x32   : > { %479 = vmatmul.mubr.bf16.vlgmr.msra.gmra.mxu0 %v845_v63 }
  0x33   : > { %488 = vmatprep.mubr.bf16.mxu0 %v882_v0 }
  0x3a   : > { %489 = vmatmul.mubr.bf16.gmra.mxu0 %v846_v1 }
  0x3b   : > { %498 = vmatprep.mubr.bf16.mxu0 %v882_v0 }
  0x42   : > { %499 = vmatmul.mubr.bf16.gmra.mxu0 %v847_v2 }
  0x43   : > { %508 = vmatprep.mubr.bf16.mxu0 %v882_v0 }
  0x4a   : > { %509 = vmatmul.mubr.bf16.gmra.mxu0 %v848_v3 }
  0x8a   : > { %v405_v13 = vpop.permute.xlu1 %404  ;;  %v415_v15 = vpop.permute.xlu0 %414 }
  0x8e   : > { %v420_v19 = vpop.permute.xlu0 %419 }
  0x8f   : > { %v410_v0 = vpop.permute.xlu1 %409 }
  0x92   : > { %v395_v30 = vpop.permute.xlu0 %394 }
  0x93   : > { %v400_v25 = vpop.permute.xlu1 %399 }
  0x96   : > { %v385_v49 = vpop.permute.xlu0 %384 }
  0x97   : > { %v390_v42 = vpop.permute.xlu1 %389 }
  0xf2   : > { %v480_v4 = vpop.f32.mrf.mxu0 }
  0xf3   : > { %v481_v59 = vadd.f32 %v480_v4, %v385_v49 }
  0xf4   : > { %v482_v5 = vpop.f32.mrf.mxu0 }
  0xf5   : > { %v483_v52 = vadd.f32 %v482_v5, %v385_v49  ;;  %v519_v2 = vmax.f32 %v481_v59, 0.0  ;;  %v849_v5 = vld [vmem:[%s1056_s3] sm:$0xff]  }
  0xf6   : > { %v484_v6 = vpop.f32.mrf.mxu0 }
  0xf7   : > { %v485_v54 = vadd.f32 %v484_v6, %v390_v42  ;;  %v520_v61 = vmax.f32 %v483_v52, 0.0  ;;  %v550_v6 = vpop.permute.xlu0 %549 }
  0xf8   : > { %v486_v7 = vpop.f32.mrf.mxu0 }
  0xf9   : > { %v487_v46 = vadd.f32 %v486_v7, %v390_v42  ;;  %v521_v62 = vmax.f32 %v485_v54, 0.0 }
  0xfa   : > { %v490_v8 = vpop.f32.mrf.mxu0 }
  0xfb   : > { %v491_v50 = vadd.f32 %v490_v8, %v395_v30  ;;  %v522_v57 = vmax.f32 %v487_v46, 0.0  ;;  %v535_v3 = vpack.c.bf16 %v521_v62, %v519_v2 }
  0xfc   : > { %v492_v9 = vpop.f32.mrf.mxu0 }
  0xfd   : > { %v493_v39 = vadd.f32 %v492_v9, %v395_v30  ;;  %v523_v60 = vmax.f32 %v491_v50, 0.0  ;;  %v536_v1 = vpack.c.bf16 %v522_v57, %v520_v61  ;;  %v842_v9 = vpop.permute.xlu0 %841 }
  0xfe   : > { %v494_v10 = vpop.f32.mrf.mxu0 }
  0xff   : > { %v495_v43 = vadd.f32 %v494_v10, %v400_v25  ;;  %v524_v53 = vmax.f32 %v493_v39, 0.0 }
 0x100   : > { %v496_v11 = vpop.f32.mrf.mxu0 }
 0x101   : > { %v497_v33 = vadd.f32 %v496_v11, %v400_v25  ;;  %v525_v55 = vmax.f32 %v495_v43, 0.0  ;;  %v555_v11 = vpop.permute.xlu1 %554 }
 0x102   : > { %v500_v12 = vpop.f32.mrf.mxu0 }
 0x103   : > { %v501_v37 = vadd.f32 %v500_v12, %v405_v13  ;;  %v526_v47 = vmax.f32 %v497_v33, 0.0  ;;  %v537_v63 = vpack.c.bf16 %v525_v55, %v523_v60 }
 0x104   : > { %v502_v14 = vpop.f32.mrf.mxu0 }
 0x105   : > { %v503_v28 = vadd.f32 %v502_v14, %v405_v13  ;;  %v527_v51 = vmax.f32 %v501_v37, 0.0  ;;  %v538_v58 = vpack.c.bf16 %v526_v47, %v524_v53 }
 0x106   : > { %v504_v16 = vpop.f32.mrf.mxu0 }
 0x107   : > { %v505_v31 = vadd.f32 %v504_v16, %v410_v0  ;;  %v528_v40 = vmax.f32 %v503_v28, 0.0 }
 0x108   : > { %v506_v17 = vpop.f32.mrf.mxu0 }
 0x109   : > { %v507_v22 = vadd.f32 %v506_v17, %v410_v0  ;;  %v529_v44 = vmax.f32 %v505_v31, 0.0  ;;  %v843_v17 = vunpack.i.l.bf16 %v842_v9 }
 0x10a   : > { %v510_v18 = vpop.f32.mrf.mxu0 }
 0x10b   : > { %v511_v26 = vadd.f32 %v510_v18, %v415_v15  ;;  %v530_v34 = vmax.f32 %v507_v22, 0.0  ;;  %v539_v56 = vpack.c.bf16 %v529_v44, %v527_v51 }
 0x10c   : > { %v512_v20 = vpop.f32.mrf.mxu0 }
 0x10d   : > { %v513_v23 = vadd.f32 %v512_v20, %v415_v15  ;;  %v531_v38 = vmax.f32 %v511_v26, 0.0  ;;  %v540_v48 = vpack.c.bf16 %v530_v34, %v528_v40  ;;  %v844_v15 = vunpack.i.h.bf16 %v842_v9 }
 0x10e   : > { %v514_v21 = vpop.f32.mrf.mxu0 }
 0x10f   : > { %v515_v24 = vadd.f32 %v514_v21, %v420_v19  ;;  %v532_v35 = vmax.f32 %v513_v23, 0.0 }
 0x110   : > { %v516_v27 = vpop.f32.mrf.mxu0 }
 0x111   : > { %v517_v29 = vadd.f32 %v516_v27, %v420_v19  ;;  %v533_v32 = vmax.f32 %v515_v24, 0.0 }
 0x113   : > { %v534_v36 = vmax.f32 %v517_v29, 0.0  ;;  %v541_v45 = vpack.c.bf16 %v533_v32, %v531_v38 }
 0x115   : > { %v542_v41 = vpack.c.bf16 %v534_v36, %v532_v35  ;;  %v646_v36 = vstv %s645_s22 }
 0x117   : > { %574 = vmatprep.subr.bf16.mxu1 %v542_v41 }
 0x118   : > { %575 = vmatpush1.bf16.msra.mxu1 %v541_v45 }
 0x119   : > { %576 = vmatprep.subr.bf16.mxu1 %v540_v48 }
 0x11c   : > { %577 = vmatpush1.bf16.msra.mxu1 %v539_v56  ;;  %v883_v56 = vmov 1966171168  }
 0x11d   : > { %578 = vmatprep.subr.bf16.mxu1 %v538_v58  ;;  %v685_v57 = vunpack.c.l.s4 %v883_v56  ;;  %v687_v58 = vlaneseq }
 0x11f   : > { %v686_v2 = vunpack.c.0.s8 %v685_v57 }
 0x120   : > { %579 = vmatpush1.bf16.msra.mxu1 %v537_v63 }
 0x121   : > { %580 = vmatprep.subr.bf16.mxu1 %v536_v1 }
 0x124   : > { %581 = vmatpush1.bf16.msra.mxu1 %v535_v3  ;;  %v688_v3 = vshrl.u32 %v687_v58, 7 }
 0x127   : > { %803 = vmatmul.mubr.msk.bf16.vlgmr.msra.gmra.mxu1 %vm562_vm0, %v849_v5 }
 0x1e7   : > { %v600_v4 = vpop.f32.mrf.mxu1 }
 0x1e8   : > { %v601_v7 = vadd.f32 %v600_v4, %v550_v6 }
 0x1e9   : > { %v602_v8 = vpop.f32.mrf.mxu1 }
 0x1ea   : > { %v603_v10 = vadd.f32 %v602_v8, %v550_v6  ;;  %v609_v13 = vmax.f32 %v601_v7, 0.0 }
 0x1eb   : > { %v604_v12 = vpop.f32.mrf.mxu1 }
 0x1ec   : > { %v605_v14 = vadd.f32 %v604_v12, %v555_v11  ;;  %v610_v0 = vmax.f32 %v603_v10, 0.0  ;;  %v627_v20 = vmul.f32 %v843_v17, %v609_v13  ;;  %v689_v12 = vsub.s32 %v686_v2, %v688_v3 }
 0x1ed   : > { %v606_v16 = vpop.f32.mrf.mxu1 }
 0x1ee   : > { %v611_v18 = vmax.f32 %v605_v14, 0.0  ;;  %v607_v19 = vadd.f32 %v606_v16, %v555_v11  ;;  %v628_v23 = vmul.f32 %v843_v17, %v610_v0 }
 0x1f0   : > { %v629_v21 = vmul.f32 %v844_v15, %v611_v18  ;;  %v612_v22 = vmax.f32 %v607_v19, 0.0 }
 0x1f2   : > { %v631_v24 = vadd.f32 %v629_v21, %v627_v20  ;;  %v630_v25 = vmul.f32 %v844_v15, %v612_v22  ;;  %v706_v15 = vld [vmem:[%s315_s29] sm:$0x3] }
 0x1f4   : > { %v632_v26 = vrot.slane %v631_v24, 4  ;;  %v638_v27 = vadd.f32 %v630_v25, %v628_v23 }
 0x1f6   : > { %v633_v28 = vadd.f32 %v632_v26, %v631_v24  ;;  %v639_v29 = vrot.slane %v638_v27, 4 }
 0x1f8   : > { %v634_v30 = vrot.slane %v633_v28, 2  ;;  %v640_v31 = vadd.f32 %v639_v29, %v638_v27 }
 0x1fa   : > { %v635_v32 = vadd.f32 %v634_v30, %v633_v28  ;;  %v641_v33 = vrot.slane %v640_v31, 2 }
 0x1fc   : > { %v636_v34 = vrot.slane %v635_v32, 1  ;;  %v642_v35 = vadd.f32 %v641_v33, %v640_v31 }
 0x1fe   : > { %v637_v37 = vadd.f32 %v636_v34, %v635_v32  ;;  %v643_v38 = vrot.slane %v642_v35, 1 }
 0x200   : > { %v647_v39 = vadd.f32 %v646_v36, %v637_v37  ;;  %v644_v40 = vadd.f32 %v643_v38, %v642_v35 }
 0x202   : > { %v651_v41 = vand.u32 2147483647, %v647_v39  ;;  %v648_v42 = vadd.f32 %v646_v36, %v644_v40  ;;  %v649_v7 = vmax.f32 %v647_v39, 0.0 }
 0x204   : > { %v653_v43 = vsub.f32 0.0, %v651_v41  ;;  %v652_v44 = vand.u32 2147483647, %v648_v42  ;;  %v650_v8 = vmax.f32 %v648_v42, 0.0 }
 0x206   : > { %v655_v45 = vmul.f32 1.442695, %v653_v43  ;;  %v654_v46 = vsub.f32 0.0, %v652_v44 }
 0x208   : > { %850 = vpow2.f32 %v655_v45  ;;  %v657_v47 = vmul.f32 1.442695, %v654_v46 }
 0x20a   : > { %852 = vpow2.f32 %v657_v47 }
 0x215   : > { %v851_v48 = vpop.eup %850 }
 0x216   : > { %v659_v49 = vadd.f32 1.0, %v851_v48  ;;  %v662_v52 = vmul.f32 -0.5, %v851_v48  ;;  %v665_v55 = vand.u32 2147483647, %v851_v48 }
 0x217   : > { %v853_v50 = vpop.eup %852 }
 0x218   : > { %854 = vlog2.f32 %v659_v49  ;;  %v668_v51 = vadd.f32 1.0, %v853_v50  ;;  %v671_v53 = vmul.f32 -0.5, %v853_v50  ;;  %v663_v54 = vadd.f32 1.0, %v662_v52 }
 0x219   : > { %v674_v61 = vand.u32 2147483647, %v853_v50  ;;  %vm666_vm1 = vcmp.lt.f32.partialorder %v665_v55, 0.0004427343 }
 0x21a   : > { %856 = vlog2.f32 %v668_v51  ;;  %v672_v59 = vadd.f32 1.0, %v671_v53  ;;  %v664_v63 = vmul.f32 %v851_v48, %v663_v54 }
 0x21b   : > { %vm675_vm3 = vcmp.lt.f32.partialorder %v674_v61, 0.0004427343 }
 0x21c   : > { %v673_v4 = vmul.f32 %v853_v50, %v672_v59 }
 0x225   : > { %v855_v60 = vpop.eup %854 }
 0x226   : > { %v661_v62 = vmul.f32 0.6931472, %v855_v60 }
 0x227   : > { %v857_v1 = vpop.eup %856 }
 0x228   : > { %v667_v5 = vsel %vm666_vm1, %v664_v63, %v661_v62  ;;  %v670_v6 = vmul.f32 0.6931472, %v857_v1 }
 0x229   : > { %v677_v10 = vadd.f32 %v667_v5, %v649_v7 }
 0x22a   : > { %v676_v9 = vsel %vm675_vm3, %v673_v4, %v670_v6 }
 0x22b   : > { %v678_v11 = vadd.f32 %v676_v9, %v650_v8 }
 0x22d   : > { %v804_v13 = vpack.c.bf16 %v678_v11, %v677_v10 }
 0x22f   : > { %v690_v14 = vrot.slane %v804_v13, %v689_v12 }
 0x231   : > { %v697_v16 = vrot.slane %v690_v14, %v689_v12 }
 0x233   : > { %v707_v17 = vsel %vm705_vm9, %v697_v16, %v706_v15 }
 0x234   : > { %708 = vst [vmem:[%s315_s29] sm:$0x3] %v707_v17 }
 0x235 PF: > { %s18_s28 = sadd.s32 1, %s880_s28   ;;  %s1061_s26 = smov %s876_s27 }
 0x236   : > { %p15_p5 = scmp.ge.s32.totalorder %s18_s28, 4   ;;  %s1062_s27 = smov %s1064_s6 }
 0x238   :  { %17 = sbr.rel (!%p15_p5) target bundleno = 2 (0x2), region = 78 }

</bundles_post_ra>
